<compile_context>
chip_gen: v6e
topology: v6e:2x2x1
jax: 0.10.0
libtpu: 0.0.40
codegen_flags: <defaults>
</compile_context>

<pallas_src>
import jax
import jax.numpy as jnp
from jax.experimental import pallas as pl
from jax.experimental.pallas import tpu as pltpu

NUM_ACTIONS = 3  # Actions.NUM_ACTIONS in the reference code


def _lstm_action_kernel(x_ref, h0_ref, c0_ref, wih_ref, whh_ref, b_ref,
                        wlin_ref, blin_ref,
                        logp_ref, h_out_ref, c_out_ref):
    """Single-timestep multi-layer LSTM -> relu -> linear -> log_softmax.

    x_ref    : (1, H)        concatenated feature row
    h0_ref   : (L, 1, H)     previous hidden state
    c0_ref   : (L, 1, H)     previous cell state
    wih_ref  : (L, H, 4H)    input->gates weights (already transposed)
    whh_ref  : (L, H, 4H)    hidden->gates weights (already transposed)
    b_ref    : (L, 1, 4H)    b_ih + b_hh (pre-fused)
    wlin_ref : (H, A)        linear weights (already transposed)
    blin_ref : (1, A)        linear bias
    logp_ref : (1, A)        output log probabilities
    h_out_ref: (L, 1, H)     new hidden state
    c_out_ref: (L, 1, H)     new cell state
    """
    H = x_ref.shape[-1]
    num_layers = h0_ref.shape[0]

    def sigmoid(t):
        # One EUP op (tanh) + VALU mul/add; avoids exp + reciprocal.
        return 0.5 * jnp.tanh(0.5 * t) + 0.5

    x = x_ref[...].astype(jnp.float32)                      # (1, H)

    # Static unroll over layers (num_layers is small and known at trace time).
    for layer in range(num_layers):
        h_prev = h0_ref[layer].astype(jnp.float32)          # (1, H)
        c_prev = c0_ref[layer].astype(jnp.float32)          # (1, H)

        gates = (jnp.dot(x, wih_ref[layer],
                         preferred_element_type=jnp.float32)
                 + jnp.dot(h_prev, whh_ref[layer],
                           preferred_element_type=jnp.float32)
                 + b_ref[layer])                            # (1, 4H)

        # PyTorch gate order: input, forget, cell(g), output. Static slices.
        i_g = sigmoid(gates[:, 0 * H:1 * H])
        f_g = sigmoid(gates[:, 1 * H:2 * H])
        g_g = jnp.tanh(gates[:, 2 * H:3 * H])
        o_g = sigmoid(gates[:, 3 * H:4 * H])

        c_new = f_g * c_prev + i_g * g_g
        h_new = o_g * jnp.tanh(c_new)

        h_out_ref[layer] = h_new.astype(h_out_ref.dtype)
        c_out_ref[layer] = c_new.astype(c_out_ref.dtype)

        # TODO(synk): inter-layer dropout in nn.LSTM is training-only; this is
        # the inference forward pass, so it is intentionally a no-op here.
        x = h_new

    # relu -> linear -> log_softmax (numerically stable, over A lanes).
    top = jnp.maximum(x, 0.0)                               # (1, H)
    logits = (jnp.dot(top, wlin_ref[...],
                      preferred_element_type=jnp.float32)
              + blin_ref[...])                              # (1, A)
    m = jnp.max(logits, axis=-1, keepdims=True)
    s = logits - m
    lse = jnp.log(jnp.sum(jnp.exp(s), axis=-1, keepdims=True))
    logp_ref[...] = (s - lse).astype(logp_ref.dtype)


def lstm_action_chooser_forward(inputs, params, hidden):
    """Pallas implementation of LSTMActionChooser.forward.

    inputs : list of (1, d_i) float32 feature arrays (concatenated to input_dim)
    params : dict of stacked/pre-transposed weights (see init_params)
    hidden : tuple (h, c), each (num_layers, 1, input_dim)
    returns: (log_probs (1, NUM_ACTIONS), (h_new, c_new))
    """
    # torch.cat(inputs, dim=-1).view(1, 1, -1)  -- layout glue, done outside
    # the kernel (no in-kernel concatenate).
    features = jnp.concatenate(inputs, axis=-1).reshape(1, -1)
    h0, c0 = hidden
    num_layers, _, H = h0.shape
    assert features.shape == (1, H), "concatenated features must equal input_dim"

    vmem = pl.BlockSpec(memory_space=pltpu.MemorySpace.VMEM)
    out_shapes = (
        jax.ShapeDtypeStruct((1, NUM_ACTIONS), jnp.float32),
        jax.ShapeDtypeStruct((num_layers, 1, H), jnp.float32),
        jax.ShapeDtypeStruct((num_layers, 1, H), jnp.float32),
    )

    log_probs, h_new, c_new = pl.pallas_call(
        _lstm_action_kernel,
        out_shape=out_shapes,
        in_specs=[vmem] * 8,
        out_specs=(vmem, vmem, vmem),
    )(features, h0, c0,
      params["w_ih_t"], params["w_hh_t"], params["b"],
      params["w_lin_t"], params["b_lin"])

    return log_probs, (h_new, c_new)


def init_params(key, input_dim, num_layers):
    """Deterministic parameters mimicking nn.LSTM / nn.Linear layout."""
    H = input_dim
    bound = 1.0 / (H ** 0.5)
    keys = jax.random.split(key, 4 * num_layers + 2)

    w_ih_t, w_hh_t, b = [], [], []
    k = 0
    for _ in range(num_layers):
        w_ih = jax.random.uniform(keys[k], (4 * H, H), minval=-bound, maxval=bound); k += 1
        w_hh = jax.random.uniform(keys[k], (4 * H, H), minval=-bound, maxval=bound); k += 1
        b_ih = jax.random.uniform(keys[k], (4 * H,), minval=-bound, maxval=bound); k += 1
        b_hh = jax.random.uniform(keys[k], (4 * H,), minval=-bound, maxval=bound); k += 1
        w_ih_t.append(w_ih.T)                 # (H, 4H): pre-transposed for x @ W
        w_hh_t.append(w_hh.T)                 # (H, 4H)
        b.append((b_ih + b_hh)[None, :])      # (1, 4H): fuse the two biases

    w_lin = jax.random.uniform(keys[k], (NUM_ACTIONS, H), minval=-bound, maxval=bound); k += 1
    b_lin = jax.random.uniform(keys[k], (NUM_ACTIONS,), minval=-bound, maxval=bound)

    return dict(
        w_ih_t=jnp.stack(w_ih_t).astype(jnp.float32),   # (L, H, 4H)
        w_hh_t=jnp.stack(w_hh_t).astype(jnp.float32),   # (L, H, 4H)
        b=jnp.stack(b).astype(jnp.float32),             # (L, 1, 4H)
        w_lin_t=w_lin.T.astype(jnp.float32),            # (H, A)
        b_lin=b_lin[None, :].astype(jnp.float32),       # (1, A)
    )


def init_hidden(input_dim, num_layers):
    return (jnp.zeros((num_layers, 1, input_dim), jnp.float32),
            jnp.zeros((num_layers, 1, input_dim), jnp.float32))


def _ref_forward(features, h0, c0, wih_t, whh_t, b, wlin_t, blin):
    """Pure-JAX reference with identical math."""
    x = features
    H = x.shape[-1]
    hs, cs = [], []
    for layer in range(h0.shape[0]):
        gates = x @ wih_t[layer] + h0[layer] @ whh_t[layer] + b[layer]
        i_g = jax.nn.sigmoid(gates[:, 0 * H:1 * H])
        f_g = jax.nn.sigmoid(gates[:, 1 * H:2 * H])
        g_g = jnp.tanh(gates[:, 2 * H:3 * H])
        o_g = jax.nn.sigmoid(gates[:, 3 * H:4 * H])
        c = f_g * c0[layer] + i_g * g_g
        h = o_g * jnp.tanh(c)
        hs.append(h)
        cs.append(c)
        x = h
    logits = jnp.maximum(x, 0.0) @ wlin_t + blin
    return jax.nn.log_softmax(logits, axis=-1), jnp.stack(hs), jnp.stack(cs)


if __name__ == "__main__":
    input_dim = 32
    num_layers = 2
    dropout = 0.1  # unused at inference (see TODO in kernel)

    key = jax.random.PRNGKey(0)
    k_params, k_feats = jax.random.split(key)
    params = init_params(k_params, input_dim, num_layers)
    hidden = init_hidden(input_dim, num_layers)

    # Four feature embeddings of size 8 each -> concatenated input_dim = 32.
    feat_keys = jax.random.split(k_feats, 4)
    inputs = [jax.random.normal(fk, (1, input_dim // 4), dtype=jnp.float32)
              for fk in feat_keys]

    log_probs, (h_new, c_new) = lstm_action_chooser_forward(inputs, params, hidden)
    log_probs = jax.block_until_ready(log_probs)
    h_new = jax.block_until_ready(h_new)
    c_new = jax.block_until_ready(c_new)

    # Reference check.
    features = jnp.concatenate(inputs, axis=-1).reshape(1, -1)
    ref_logp, ref_h, ref_c = _ref_forward(
        features, hidden[0], hidden[1],
        params["w_ih_t"], params["w_hh_t"], params["b"],
        params["w_lin_t"], params["b_lin"])

    assert log_probs.shape == (1, NUM_ACTIONS)
    assert h_new.shape == (num_layers, 1, input_dim)
    assert c_new.shape == (num_layers, 1, input_dim)
    assert jnp.allclose(log_probs, ref_logp, atol=2e-3, rtol=2e-3), "log_probs mismatch"
    assert jnp.allclose(h_new, ref_h, atol=2e-3, rtol=2e-3), "hidden h mismatch"
    assert jnp.allclose(c_new, ref_c, atol=2e-3, rtol=2e-3), "hidden c mismatch"
    assert jnp.allclose(jnp.sum(jnp.exp(log_probs)), 1.0, atol=1e-4), "not a log distribution"

    print("KERNEL_OK")
</pallas_src>

<mosaic_0001>
module attributes {stable_mosaic.version = 11 : i64} {
  func.func @_lstm_action_kernel(%arg0: memref<1x32xf32, #tpu.memory_space<vmem>>, %arg1: memref<2x1x32xf32, #tpu.memory_space<vmem>>, %arg2: memref<2x1x32xf32, #tpu.memory_space<vmem>>, %arg3: memref<2x32x128xf32, #tpu.memory_space<vmem>>, %arg4: memref<2x32x128xf32, #tpu.memory_space<vmem>>, %arg5: memref<2x1x128xf32, #tpu.memory_space<vmem>>, %arg6: memref<32x3xf32, #tpu.memory_space<vmem>>, %arg7: memref<1x3xf32, #tpu.memory_space<vmem>>, %arg8: memref<1x3xf32, #tpu.memory_space<vmem>>, %arg9: memref<2x1x32xf32, #tpu.memory_space<vmem>>, %arg10: memref<2x1x32xf32, #tpu.memory_space<vmem>>) attributes {dimension_semantics = [], scalar_prefetch = 0 : i64, scratch_operands = 0 : i64, tpu.core_type = #tpu.core_type<tc>} {
    %c0 = arith.constant 0 : index
    %c0_0 = arith.constant 0 : index
    %0 = vector.load %arg0[%c0, %c0_0] : memref<1x32xf32, #tpu.memory_space<vmem>>, vector<1x32xf32>
    %c0_1 = arith.constant 0 : index
    %c0_2 = arith.constant 0 : index
    %c0_3 = arith.constant 0 : index
    %1 = vector.load %arg1[%c0_1, %c0_2, %c0_3] : memref<2x1x32xf32, #tpu.memory_space<vmem>>, vector<1x1x32xf32>
    %2 = vector.shape_cast %1 : vector<1x1x32xf32> to vector<1x32xf32>
    %c0_4 = arith.constant 0 : index
    %c0_5 = arith.constant 0 : index
    %c0_6 = arith.constant 0 : index
    %3 = vector.load %arg2[%c0_4, %c0_5, %c0_6] : memref<2x1x32xf32, #tpu.memory_space<vmem>>, vector<1x1x32xf32>
    %4 = vector.shape_cast %3 : vector<1x1x32xf32> to vector<1x32xf32>
    %c0_7 = arith.constant 0 : index
    %c0_8 = arith.constant 0 : index
    %c0_9 = arith.constant 0 : index
    %5 = vector.load %arg3[%c0_7, %c0_8, %c0_9] : memref<2x32x128xf32, #tpu.memory_space<vmem>>, vector<1x32x128xf32>
    %6 = vector.shape_cast %5 : vector<1x32x128xf32> to vector<32x128xf32>
    %cst = arith.constant dense<0.000000e+00> : vector<1x128xf32>
    %7 = tpu.matmul %0, %6, %cst {dimension_numbers = #tpu.dot_dimension_numbers<[1], [0], [0], [1], [0, 0, 1, 1], [], []>} : vector<1x32xf32>, vector<32x128xf32>, vector<1x128xf32> -> vector<1x128xf32>
    %c0_10 = arith.constant 0 : index
    %c0_11 = arith.constant 0 : index
    %c0_12 = arith.constant 0 : index
    %8 = vector.load %arg4[%c0_10, %c0_11, %c0_12] : memref<2x32x128xf32, #tpu.memory_space<vmem>>, vector<1x32x128xf32>
    %9 = vector.shape_cast %8 : vector<1x32x128xf32> to vector<32x128xf32>
    %cst_13 = arith.constant dense<0.000000e+00> : vector<1x128xf32>
    %10 = tpu.matmul %2, %9, %cst_13 {dimension_numbers = #tpu.dot_dimension_numbers<[1], [0], [0], [1], [0, 0, 1, 1], [], []>} : vector<1x32xf32>, vector<32x128xf32>, vector<1x128xf32> -> vector<1x128xf32>
    %11 = arith.addf %7, %10 : vector<1x128xf32>
    %c0_14 = arith.constant 0 : index
    %c0_15 = arith.constant 0 : index
    %c0_16 = arith.constant 0 : index
    %12 = vector.load %arg5[%c0_14, %c0_15, %c0_16] : memref<2x1x128xf32, #tpu.memory_space<vmem>>, vector<1x1x128xf32>
    %13 = vector.shape_cast %12 : vector<1x1x128xf32> to vector<1x128xf32>
    %14 = arith.addf %11, %13 : vector<1x128xf32>
    %15 = vector.extract_strided_slice %14 {offsets = [0, 0], sizes = [1, 32], strides = [1, 1]} : vector<1x128xf32> to vector<1x32xf32>
    %cst_17 = arith.constant 5.000000e-01 : f32
    %16 = vector.broadcast %cst_17 : f32 to vector<1x32xf32>
    %17 = arith.mulf %16, %15 : vector<1x32xf32>
    %18 = math.tanh %17 : vector<1x32xf32>
    %cst_18 = arith.constant 5.000000e-01 : f32
    %19 = vector.broadcast %cst_18 : f32 to vector<1x32xf32>
    %20 = arith.mulf %19, %18 : vector<1x32xf32>
    %cst_19 = arith.constant 5.000000e-01 : f32
    %21 = vector.broadcast %cst_19 : f32 to vector<1x32xf32>
    %22 = arith.addf %20, %21 : vector<1x32xf32>
    %23 = vector.extract_strided_slice %14 {offsets = [0, 32], sizes = [1, 32], strides = [1, 1]} : vector<1x128xf32> to vector<1x32xf32>
    %cst_20 = arith.constant 5.000000e-01 : f32
    %24 = vector.broadcast %cst_20 : f32 to vector<1x32xf32>
    %25 = arith.mulf %24, %23 : vector<1x32xf32>
    %26 = math.tanh %25 : vector<1x32xf32>
    %cst_21 = arith.constant 5.000000e-01 : f32
    %27 = vector.broadcast %cst_21 : f32 to vector<1x32xf32>
    %28 = arith.mulf %27, %26 : vector<1x32xf32>
    %cst_22 = arith.constant 5.000000e-01 : f32
    %29 = vector.broadcast %cst_22 : f32 to vector<1x32xf32>
    %30 = arith.addf %28, %29 : vector<1x32xf32>
    %31 = vector.extract_strided_slice %14 {offsets = [0, 64], sizes = [1, 32], strides = [1, 1]} : vector<1x128xf32> to vector<1x32xf32>
    %32 = math.tanh %31 : vector<1x32xf32>
    %33 = vector.extract_strided_slice %14 {offsets = [0, 96], sizes = [1, 32], strides = [1, 1]} : vector<1x128xf32> to vector<1x32xf32>
    %cst_23 = arith.constant 5.000000e-01 : f32
    %34 = vector.broadcast %cst_23 : f32 to vector<1x32xf32>
    %35 = arith.mulf %34, %33 : vector<1x32xf32>
    %36 = math.tanh %35 : vector<1x32xf32>
    %cst_24 = arith.constant 5.000000e-01 : f32
    %37 = vector.broadcast %cst_24 : f32 to vector<1x32xf32>
    %38 = arith.mulf %37, %36 : vector<1x32xf32>
    %cst_25 = arith.constant 5.000000e-01 : f32
    %39 = vector.broadcast %cst_25 : f32 to vector<1x32xf32>
    %40 = arith.addf %38, %39 : vector<1x32xf32>
    %41 = arith.mulf %30, %4 : vector<1x32xf32>
    %42 = arith.mulf %22, %32 : vector<1x32xf32>
    %43 = arith.addf %41, %42 : vector<1x32xf32>
    %44 = math.tanh %43 : vector<1x32xf32>
    %45 = arith.mulf %40, %44 : vector<1x32xf32>
    %c0_26 = arith.constant 0 : index
    %c0_27 = arith.constant 0 : index
    %c0_28 = arith.constant 0 : index
    %46 = vector.load %arg9[%c0_26, %c0_27, %c0_28] : memref<2x1x32xf32, #tpu.memory_space<vmem>>, vector<1x1x32xf32>
    %47 = vector.shape_cast %46 : vector<1x1x32xf32> to vector<1x32xf32>
    %48 = vector.shape_cast %45 : vector<1x32xf32> to vector<1x1x32xf32>
    tpu.vector_store %arg9[%c0_26, %c0_27, %c0_28], %48 {strides = array<i32>} : memref<2x1x32xf32, #tpu.memory_space<vmem>>, vector<1x1x32xf32>,
    %c0_29 = arith.constant 0 : index
    %c0_30 = arith.constant 0 : index
    %c0_31 = arith.constant 0 : index
    %49 = vector.load %arg10[%c0_29, %c0_30, %c0_31] : memref<2x1x32xf32, #tpu.memory_space<vmem>>, vector<1x1x32xf32>
    %50 = vector.shape_cast %49 : vector<1x1x32xf32> to vector<1x32xf32>
    %51 = vector.shape_cast %43 : vector<1x32xf32> to vector<1x1x32xf32>
    tpu.vector_store %arg10[%c0_29, %c0_30, %c0_31], %51 {strides = array<i32>} : memref<2x1x32xf32, #tpu.memory_space<vmem>>, vector<1x1x32xf32>,
    %c1 = arith.constant 1 : index
    %c0_32 = arith.constant 0 : index
    %c0_33 = arith.constant 0 : index
    %52 = vector.load %arg1[%c1, %c0_32, %c0_33] : memref<2x1x32xf32, #tpu.memory_space<vmem>>, vector<1x1x32xf32>
    %53 = vector.shape_cast %52 : vector<1x1x32xf32> to vector<1x32xf32>
    %c1_34 = arith.constant 1 : index
    %c0_35 = arith.constant 0 : index
    %c0_36 = arith.constant 0 : index
    %54 = vector.load %arg2[%c1_34, %c0_35, %c0_36] : memref<2x1x32xf32, #tpu.memory_space<vmem>>, vector<1x1x32xf32>
    %55 = vector.shape_cast %54 : vector<1x1x32xf32> to vector<1x32xf32>
    %c1_37 = arith.constant 1 : index
    %c0_38 = arith.constant 0 : index
    %c0_39 = arith.constant 0 : index
    %56 = vector.load %arg3[%c1_37, %c0_38, %c0_39] : memref<2x32x128xf32, #tpu.memory_space<vmem>>, vector<1x32x128xf32>
    %57 = vector.shape_cast %56 : vector<1x32x128xf32> to vector<32x128xf32>
    %cst_40 = arith.constant dense<0.000000e+00> : vector<1x128xf32>
    %58 = tpu.matmul %45, %57, %cst_40 {dimension_numbers = #tpu.dot_dimension_numbers<[1], [0], [0], [1], [0, 0, 1, 1], [], []>} : vector<1x32xf32>, vector<32x128xf32>, vector<1x128xf32> -> vector<1x128xf32>
    %c1_41 = arith.constant 1 : index
    %c0_42 = arith.constant 0 : index
    %c0_43 = arith.constant 0 : index
    %59 = vector.load %arg4[%c1_41, %c0_42, %c0_43] : memref<2x32x128xf32, #tpu.memory_space<vmem>>, vector<1x32x128xf32>
    %60 = vector.shape_cast %59 : vector<1x32x128xf32> to vector<32x128xf32>
    %cst_44 = arith.constant dense<0.000000e+00> : vector<1x128xf32>
    %61 = tpu.matmul %53, %60, %cst_44 {dimension_numbers = #tpu.dot_dimension_numbers<[1], [0], [0], [1], [0, 0, 1, 1], [], []>} : vector<1x32xf32>, vector<32x128xf32>, vector<1x128xf32> -> vector<1x128xf32>
    %62 = arith.addf %58, %61 : vector<1x128xf32>
    %c1_45 = arith.constant 1 : index
    %c0_46 = arith.constant 0 : index
    %c0_47 = arith.constant 0 : index
    %63 = vector.load %arg5[%c1_45, %c0_46, %c0_47] : memref<2x1x128xf32, #tpu.memory_space<vmem>>, vector<1x1x128xf32>
    %64 = vector.shape_cast %63 : vector<1x1x128xf32> to vector<1x128xf32>
    %65 = arith.addf %62, %64 : vector<1x128xf32>
    %66 = vector.extract_strided_slice %65 {offsets = [0, 0], sizes = [1, 32], strides = [1, 1]} : vector<1x128xf32> to vector<1x32xf32>
    %cst_48 = arith.constant 5.000000e-01 : f32
    %67 = vector.broadcast %cst_48 : f32 to vector<1x32xf32>
    %68 = arith.mulf %67, %66 : vector<1x32xf32>
    %69 = math.tanh %68 : vector<1x32xf32>
    %cst_49 = arith.constant 5.000000e-01 : f32
    %70 = vector.broadcast %cst_49 : f32 to vector<1x32xf32>
    %71 = arith.mulf %70, %69 : vector<1x32xf32>
    %cst_50 = arith.constant 5.000000e-01 : f32
    %72 = vector.broadcast %cst_50 : f32 to vector<1x32xf32>
    %73 = arith.addf %71, %72 : vector<1x32xf32>
    %74 = vector.extract_strided_slice %65 {offsets = [0, 32], sizes = [1, 32], strides = [1, 1]} : vector<1x128xf32> to vector<1x32xf32>
    %cst_51 = arith.constant 5.000000e-01 : f32
    %75 = vector.broadcast %cst_51 : f32 to vector<1x32xf32>
    %76 = arith.mulf %75, %74 : vector<1x32xf32>
    %77 = math.tanh %76 : vector<1x32xf32>
    %cst_52 = arith.constant 5.000000e-01 : f32
    %78 = vector.broadcast %cst_52 : f32 to vector<1x32xf32>
    %79 = arith.mulf %78, %77 : vector<1x32xf32>
    %cst_53 = arith.constant 5.000000e-01 : f32
    %80 = vector.broadcast %cst_53 : f32 to vector<1x32xf32>
    %81 = arith.addf %79, %80 : vector<1x32xf32>
    %82 = vector.extract_strided_slice %65 {offsets = [0, 64], sizes = [1, 32], strides = [1, 1]} : vector<1x128xf32> to vector<1x32xf32>
    %83 = math.tanh %82 : vector<1x32xf32>
    %84 = vector.extract_strided_slice %65 {offsets = [0, 96], sizes = [1, 32], strides = [1, 1]} : vector<1x128xf32> to vector<1x32xf32>
    %cst_54 = arith.constant 5.000000e-01 : f32
    %85 = vector.broadcast %cst_54 : f32 to vector<1x32xf32>
    %86 = arith.mulf %85, %84 : vector<1x32xf32>
    %87 = math.tanh %86 : vector<1x32xf32>
    %cst_55 = arith.constant 5.000000e-01 : f32
    %88 = vector.broadcast %cst_55 : f32 to vector<1x32xf32>
    %89 = arith.mulf %88, %87 : vector<1x32xf32>
    %cst_56 = arith.constant 5.000000e-01 : f32
    %90 = vector.broadcast %cst_56 : f32 to vector<1x32xf32>
    %91 = arith.addf %89, %90 : vector<1x32xf32>
    %92 = arith.mulf %81, %55 : vector<1x32xf32>
    %93 = arith.mulf %73, %83 : vector<1x32xf32>
    %94 = arith.addf %92, %93 : vector<1x32xf32>
    %95 = math.tanh %94 : vector<1x32xf32>
    %96 = arith.mulf %91, %95 : vector<1x32xf32>
    %c1_57 = arith.constant 1 : index
    %c0_58 = arith.constant 0 : index
    %c0_59 = arith.constant 0 : index
    %97 = vector.load %arg9[%c1_57, %c0_58, %c0_59] : memref<2x1x32xf32, #tpu.memory_space<vmem>>, vector<1x1x32xf32>
    %98 = vector.shape_cast %97 : vector<1x1x32xf32> to vector<1x32xf32>
    %99 = vector.shape_cast %96 : vector<1x32xf32> to vector<1x1x32xf32>
    tpu.vector_store %arg9[%c1_57, %c0_58, %c0_59], %99 {strides = array<i32>} : memref<2x1x32xf32, #tpu.memory_space<vmem>>, vector<1x1x32xf32>,
    %c1_60 = arith.constant 1 : index
    %c0_61 = arith.constant 0 : index
    %c0_62 = arith.constant 0 : index
    %100 = vector.load %arg10[%c1_60, %c0_61, %c0_62] : memref<2x1x32xf32, #tpu.memory_space<vmem>>, vector<1x1x32xf32>
    %101 = vector.shape_cast %100 : vector<1x1x32xf32> to vector<1x32xf32>
    %102 = vector.shape_cast %94 : vector<1x32xf32> to vector<1x1x32xf32>
    tpu.vector_store %arg10[%c1_60, %c0_61, %c0_62], %102 {strides = array<i32>} : memref<2x1x32xf32, #tpu.memory_space<vmem>>, vector<1x1x32xf32>,
    %cst_63 = arith.constant 0.000000e+00 : f32
    %103 = vector.broadcast %cst_63 : f32 to vector<1x32xf32>
    %104 = arith.maximumf %96, %103 : vector<1x32xf32>
    %c0_64 = arith.constant 0 : index
    %c0_65 = arith.constant 0 : index
    %105 = vector.load %arg6[%c0_64, %c0_65] : memref<32x3xf32, #tpu.memory_space<vmem>>, vector<32x3xf32>
    %cst_66 = arith.constant dense<0.000000e+00> : vector<1x3xf32>
    %106 = tpu.matmul %104, %105, %cst_66 {dimension_numbers = #tpu.dot_dimension_numbers<[1], [0], [0], [1], [0, 0, 1, 1], [], []>} : vector<1x32xf32>, vector<32x3xf32>, vector<1x3xf32> -> vector<1x3xf32>
    %c0_67 = arith.constant 0 : index
    %c0_68 = arith.constant 0 : index
    %107 = vector.load %arg7[%c0_67, %c0_68] : memref<1x3xf32, #tpu.memory_space<vmem>>, vector<1x3xf32>
    %108 = arith.addf %106, %107 : vector<1x3xf32>
    %cst_69 = arith.constant dense<0xFF800000> : vector<1xf32>
    %109 = vector.multi_reduction <maximumf>, %108, %cst_69 [1] : vector<1x3xf32> to vector<1xf32>
    %110 = vector.shape_cast %109 : vector<1xf32> to vector<1x1xf32>
    %111 = vector.broadcast %110 : vector<1x1xf32> to vector<1x3xf32>
    %112 = arith.subf %108, %111 : vector<1x3xf32>
    %113 = math.exp %112 : vector<1x3xf32>
    %cst_70 = arith.constant dense<0.000000e+00> : vector<1xf32>
    %114 = vector.multi_reduction <add>, %113, %cst_70 [1] : vector<1x3xf32> to vector<1xf32>
    %115 = vector.shape_cast %114 : vector<1xf32> to vector<1x1xf32>
    %116 = math.log %115 : vector<1x1xf32>
    %117 = vector.broadcast %116 : vector<1x1xf32> to vector<1x3xf32>
    %118 = arith.subf %112, %117 : vector<1x3xf32>
    %c0_71 = arith.constant 0 : index
    %c0_72 = arith.constant 0 : index
    %119 = vector.load %arg8[%c0_71, %c0_72] : memref<1x3xf32, #tpu.memory_space<vmem>>, vector<1x3xf32>
    tpu.vector_store %arg8[%c0_71, %c0_72], %118 {strides = array<i32>} : memref<1x3xf32, #tpu.memory_space<vmem>>, vector<1x3xf32>,
    return
  }
}

</mosaic_0001>

<bundles_post_ra>
// kernel: tpu_custom_call.1
= control target key start
LH: loop header
LB: loop body
LE: loop exit
PB: predicated region body
PF: predicated region fallthrough
CT: control target
= control target key end

     0   :  { %16 = vsyncpa [#allocation3], 0  ;;  %s1014_s0 = inlined_call_operand.vmem [shape: f32[1,32], index: 0, kind: input, shape index: {}]   ;;  %s1015_s1 = inlined_call_operand.vmem [shape: f32[2,1,32], index: 1, kind: input, shape index: {}]   ;;  %s1016_s2 = inlined_call_operand.vmem [shape: f32[2,1,32], index: 2, kind: input, shape index: {}]   ;;  %s1017_s3 = inlined_call_operand.hbm [shape: f32[2,32,128], index: 3, kind: input, shape index: {}]   ;;  %s1018_s4 = inlined_call_operand.hbm [shape: f32[2,32,128], index: 4, kind: input, shape index: {}]   ;;  %s1019_s5 = inlined_call_operand.vmem [shape: f32[2,1,128], index: 5, kind: input, shape index: {}]   ;;  %s1020_s6 = inlined_call_operand.vmem [shape: f32[32,3], index: 6, kind: input, shape index: {}]   ;;  %s1021_s7 = inlined_call_operand.vmem [shape: f32[1,3], index: 7, kind: input, shape index: {}]   ;;  %s1022_s8 = inlined_call_operand.hbm [shape: f32[1,3], index: 8, kind: output, shape index: {0}]   ;;  %s1023_s9 = inlined_call_operand.hbm [shape: f32[2,1,32], index: 9, kind: output, shape index: {1}]   ;;  %s1024_s10 = inlined_call_operand.hbm [shape: f32[2,1,32], index: 10, kind: output, shape index: {2}]  }
   0x1   :  { %17 = vsyncpa [#allocation6], 0 }
   0x2   :  { %18 = vsyncpa [#allocation4], 0 }
   0x3   :  { %19 = vsyncpa [#allocation9], 0  ;;  %s837_s13 = smov [#allocation2]  }
   0x4   :  { %s31_s14 = sshll.u32 %s837_s13, 4  ;;  %s32_s14 = int_to_ptr.vmem [resolvable:$true] %s31_s14 }
   0x5   :  { %s737_s15 = scalar_lea.vmem %s32_s14, 1024  ;;  %p742_p1 = scmp.lt.s32.totalorder %s32_s14, %s32_s14 }
   0x6   :  { %p738_p0 = scmp.ne.s32.totalorder %s32_s14, %s737_s15  ;;  %p743_p2 = scmp.lt.s32.totalorder %s737_s15, %s737_s15 }
   0x8   :  { %p744_p3 = por %p743_p2, %p742_p1 }
   0xa   :  { %p745_p4 = pnand %p744_p3, %p738_p0 }
   0xc   :  { %748 = shalt.err (!%p745_p4)
}
   0xd   :  { %s838_s16 = smov 128   ;;  %s839_s17 = smov 8  }
   0xe   :  { %37 = dma.hbm_to_vmem [thread:$0]  %s1017_s3, 1024, %s32_s14, [#allocation3], %s838_s16, %s838_s16, %s839_s17  }
   0xf   :  { %s840_s20 = smov [#allocation5]  }
  0x10   :  { %s43_s21 = sshll.u32 %s840_s20, 4  ;;  %s44_s21 = int_to_ptr.vmem [resolvable:$true] %s43_s21 }
  0x11   :  { %s757_s22 = scalar_lea.vmem %s44_s21, 1024  ;;  %p762_p6 = scmp.lt.s32.totalorder %s44_s21, %s44_s21 }
  0x12   :  { %p758_p5 = scmp.ne.s32.totalorder %s44_s21, %s757_s22  ;;  %p763_p7 = scmp.lt.s32.totalorder %s757_s22, %s757_s22 }
  0x14   :  { %p764_p8 = por %p763_p7, %p762_p6 }
  0x16   :  { %p765_p9 = pnand %p764_p8, %p758_p5 }
  0x18   :  { %768 = shalt.err (!%p765_p9)
}
  0x19   :  { %49 = dma.hbm_to_vmem [thread:$0]  %s1018_s4, 1024, %s44_s21, [#allocation6], %s838_s16, %s838_s16, %s839_s17  }
  0x1a   :  { %829 = dma.done.wait [#allocation3], 1024  }
  0x1b   :  { %830 = vsyncadd [#allocation3], 4294966272 }
  0x1c   :  { %831 = dma.done.wait [#allocation6], 1024  }
  0x1d   :  { %832 = vsyncadd [#allocation6], 4294966272  ;;  %v841_v0 = vmov 0.0   ;;  %vm842_vm0 = vmmov 0   ;;  %v72_v1 = vld [vmem:[#allocation5 + $0x18] sm:$0xff]  ;;  %v71_v3 = vld [vmem:[#allocation5 + $0x10] sm:$0xff] }
  0x1e   :  { %644 = vmatprep.subr.mxu0 %v841_v0  ;;  %655 = vmatprep.subr.mxu1 %v841_v0  ;;  %v68_v2 = vld [vmem:[#allocation2 + $0x18] sm:$0xff]  ;;  %v67_v4 = vld [vmem:[#allocation2 + $0x10] sm:$0xff]  ;;  %v70_v5 = vld [vmem:[#allocation5 + $0x8] sm:$0xff]  ;;  %vm73_vm1 = vcmask 261120   ;;  %s843_s28 = smov 64   ;;  %s844_s11 = smov 32  }
  0x1f   :  { %652 = vmatprep.mubr.msk.f32.mxu0 %vm842_vm0, %v841_v0  ;;  %663 = vmatprep.mubr.msk.f32.mxu1 %vm842_vm0, %v841_v0  ;;  %v66_v6 = vld [vmem:[#allocation2 + $0x8] sm:$0xff]  ;;  %v69_v7 = vld [vmem:[#allocation5] sm:$0xff]  ;;  %v276_v30 = vld [vmem:[#allocation5 + $0x38] sm:$0xff]  ;;  %vm256_vm2 = vcmask 253952   ;;  %vm548_vm3 = vcmask 16384  }
  0x20   :  { %645 = vmatpush3.msra.mxu0 %v72_v1  ;;  %656 = vmatpush3.msra.mxu1 %v68_v2  ;;  %v65_v8 = vld [vmem:[#allocation2] sm:$0xff]  ;;  %v275_v31 = vld [vmem:[#allocation5 + $0x30] sm:$0xff]  ;;  %v271_v32 = vld [vmem:[#allocation2 + $0x38] sm:$0xff] }
  0x21   :  { %646 = vmatprep.subr.mxu0 %v841_v0  ;;  %657 = vmatprep.subr.mxu1 %v841_v0  ;;  %v63_v9 = vld [vmem:[%s1015_s1] sm:$0x1]  ;;  %v270_v33 = vld [vmem:[#allocation2 + $0x30] sm:$0xff]  ;;  %v274_v34 = vld [vmem:[#allocation5 + $0x28] sm:$0xff] }
  0x22   :  { %647 = vmatpush3.msra.mxu0 %v71_v3  ;;  %658 = vmatpush3.msra.mxu1 %v67_v4  ;;  %v62_v10 = vld [vmem:[%s1014_s0] sm:$0x1]  ;;  %v269_v35 = vld [vmem:[#allocation2 + $0x28] sm:$0xff]  ;;  %v612_v38 = vld [vmem:[%s1015_s1 + $0x1] sm:$0x1] }
  0x23   :  { %648 = vmatprep.subr.mxu0 %v841_v0  ;;  %659 = vmatprep.subr.mxu1 %v841_v0  ;;  %v220_v13 = vld [vmem:[%s1019_s5] sm:$0x1]  ;;  %v617_v42 = vld [vmem:[%s1016_s2 + $0x1] ss:$0 sm:$0xff]  ;;  %v471_v62 = vld [vmem:[%s1020_s6 + $0x18] sm:$0xff] }
  0x24   :  { %649 = vmatpush3.msra.mxu0 %v70_v5  ;;  %660 = vmatpush3.msra.mxu1 %v66_v6  ;;  %v611_v19 = vld [vmem:[%s1016_s2] ss:$0 sm:$0xff]  ;;  %v616_v47 = vld [vmem:[%s1019_s5 + $0x1] sm:$0x1]  ;;  %v470_v63 = vld [vmem:[%s1020_s6 + $0x10] sm:$0xff] }
  0x25   :  { %650 = vmatprep.subr.mxu0 %v841_v0  ;;  %661 = vmatprep.subr.mxu1 %v841_v0  ;;  %v273_v36 = vld [vmem:[#allocation5 + $0x20] sm:$0xff]  ;;  %v469_v1 = vld [vmem:[%s1020_s6 + $0x8] sm:$0xff] }
  0x26   :  { %651 = vmatpush3.msra.mxu0 %v69_v7  ;;  %662 = vmatpush3.msra.mxu1 %v65_v8  ;;  %v268_v37 = vld [vmem:[#allocation2 + $0x20] sm:$0xff] }
  0x27   :  { %653 = vmatmul.mubr.msk.f32.vlgmr.msra.gmra.mxu0 %vm73_vm1, %v63_v9  ;;  %664 = vmatmul.mubr.msk.f32.vlgmr.msra.gmra.mxu1 %vm73_vm1, %v62_v10  ;;  %v468_v2 = vld [vmem:[%s1020_s6] sm:$0xff]  ;;  %s845_s6 = smov 96  }
  0x28   :  { %666 = vmatprep.subr.mxu0 %v841_v0  ;;  %677 = vmatprep.subr.mxu1 %v841_v0  ;;  %v472_v8 = vld [vmem:[%s1021_s7] sm:$0x1]  ;;  %s846_s7 = smov [#allocation8]  }
  0x29   :  { %674 = vmatprep.mubr.msk.f32.mxu0 %vm842_vm0, %v841_v0  ;;  %685 = vmatprep.mubr.msk.f32.mxu1 %vm842_vm0, %v841_v0  ;;  %s577_s3 = sshll.u32 %s846_s7, 4  ;;  %s578_s3 = int_to_ptr.vmem [resolvable:$true] %s577_s3 }
  0x2a   :  { %667 = vmatpush3.msra.mxu0 %v276_v30  ;;  %678 = vmatpush3.msra.mxu1 %v271_v32  ;;  %s769_s4 = scalar_lea.vmem %s578_s3, 32  ;;  %p774_p11 = scmp.lt.s32.totalorder %s578_s3, %s578_s3 }
  0x2b   :  { %668 = vmatprep.subr.mxu0 %v841_v0  ;;  %679 = vmatprep.subr.mxu1 %v841_v0  ;;  %p770_p10 = scmp.ne.s32.totalorder %s578_s3, %s769_s4  ;;  %p775_p12 = scmp.lt.s32.totalorder %s769_s4, %s769_s4 }
  0x2c   :  { %669 = vmatpush3.msra.mxu0 %v275_v31  ;;  %680 = vmatpush3.msra.mxu1 %v270_v33 }
  0x2d   :  { %670 = vmatprep.subr.mxu0 %v841_v0  ;;  %681 = vmatprep.subr.mxu1 %v841_v0  ;;  %p776_p13 = por %p775_p12, %p774_p11 }
  0x2e   :  { %671 = vmatpush3.msra.mxu0 %v274_v34  ;;  %682 = vmatpush3.msra.mxu1 %v269_v35 }
  0x2f   :  { %672 = vmatprep.subr.mxu0 %v841_v0  ;;  %683 = vmatprep.subr.mxu1 %v841_v0  ;;  %p777_p0 = pnand %p776_p13, %p770_p10 }
  0x30   :  { %673 = vmatpush3.msra.mxu0 %v273_v36  ;;  %684 = vmatpush3.msra.mxu1 %v268_v37 }
  0x31   :  { %675 = vmatmul.mubr.msk.f32.vlgmr.msra.gmra.mxu0 %vm73_vm1, %v612_v38  ;;  %688 = vmatprep.subr.mxu0 %v841_v0 }
  0x32   :  { %696 = vmatprep.mubr.msk.f32.mxu0 %vm842_vm0, %v841_v0  ;;  %689 = vmatpush3.msra.mxu0 %v471_v62 }
  0x33   :  { %690 = vmatprep.subr.mxu0 %v841_v0 }
  0x34   :  { %691 = vmatpush3.msra.mxu0 %v470_v63 }
  0x35   :  { %692 = vmatprep.subr.mxu0 %v841_v0 }
  0x36   :  { %693 = vmatpush3.msra.mxu0 %v469_v1 }
  0x37   :  { %694 = vmatprep.subr.mxu0 %v841_v0 }
  0x38   :  { %695 = vmatpush3.msra.mxu0 %v468_v2 }
  0xe7   :  { %v143_v11 = vpop.f32.mrf.mxu0  ;;  %v216_v12 = vpop.f32.mrf.mxu1 }
  0xe8   :  { %v217_v14 = vadd.f32 %v216_v12, %v143_v11 }
  0xe9   :  { %v654_v15 = vpop.f32.mrf.mxu0  ;;  %v665_v16 = vpop.f32.mrf.mxu1 }
  0xea   :  { %v221_v17 = vadd.f32 %v220_v13, %v217_v14 }
  0xec   :  { %713 = vtanh.f32 %v221_v17  ;;  %v222_v20 = vmul.f32 0.5, %v221_v17 }
  0xee   :  { %715 = vtanh.f32 %v222_v20 }
  0xf1   :  { %v346_v43 = vpop.f32.mrf.mxu0 }
  0xf3   :  { %v676_v44 = vpop.f32.mrf.mxu0 }
  0xf9   :  { %v714_v18 = vpop.eup %713 }
  0xfa   :  { %237 = vrot.lane.b32.xlu0 %v714_v18, %s843_s28 }
  0xfb   :  { %v716_v21 = vpop.eup %715 }
  0xfc   :  { %v224_v22 = vmul.f32 0.5, %v716_v21 }
  0xfe   :  { %232 = vrot.lane.b32.xlu0 %v611_v19, %s844_s11  ;;  %v225_v23 = vadd.f32 0.5, %v224_v22 }
 0x16c   :  { %v238_v24 = vpop.permute.xlu0 %237 }
 0x16d   :  { %v240_v25 = vmul.f32 %v238_v24, %v225_v23 }
 0x16f   :  { %242 = vrot.lane.b32.xlu1 %v240_v25, %s844_s11 }
 0x170   :  { %v233_v26 = vpop.permute.xlu0 %232 }
 0x171   :  { %v235_v27 = vmul.f32 %v233_v26, %v225_v23 }
 0x1e1   :  { %v243_v28 = vpop.permute.xlu1 %242 }
 0x1e2   :  { %v947_v29 = vadd.f32 %v243_v28, %v235_v27 }
 0x1e4   :  { %717 = vtanh.f32 %v947_v29 }
 0x1f1   :  { %v718_v39 = vpop.eup %717 }
 0x1f2   :  { %248 = vrot.lane.b32.xlu1 %v718_v39, %s843_s28 }
 0x264   :  { %v249_v40 = vpop.permute.xlu1 %248 }
 0x265   :  { %v251_v41 = vmul.f32 %v249_v40, %v225_v23 }
 0x267   :  { %253 = vrot.lane.b32.xlu0 %v251_v41, %s844_s11 }
 0x26b   :  { %435 = vrot.lane.b32.xlu0 %v617_v42, %s844_s11 }
 0x2d9   :  { %v254_v45 = vpop.permute.xlu0 %253 }
 0x2da   :  { %257 = vst.msk [vmem:[#allocation8] sm:$0x1] %vm256_vm2, %v254_v45  ;;  %686 = vmatmul.mubr.msk.f32.vlgmr.msra.gmra.mxu1 %vm73_vm1, %v254_v45 }
 0x2dd   :  { %v436_v58 = vpop.permute.xlu0 %435 }
 0x39a   :  { %v418_v46 = vpop.f32.mrf.mxu1 }
 0x39b   :  { %v419_v48 = vadd.f32 %v418_v46, %v346_v43 }
 0x39c   :  { %v687_v49 = vpop.f32.mrf.mxu1 }
 0x39d   :  { %v424_v50 = vadd.f32 %v616_v47, %v419_v48 }
 0x39f   :  { %719 = vtanh.f32 %v424_v50  ;;  %v425_v52 = vmul.f32 0.5, %v424_v50 }
 0x3a1   :  { %721 = vtanh.f32 %v425_v52 }
 0x3ac   :  { %v720_v51 = vpop.eup %719 }
 0x3ad   :  { %440 = vrot.lane.b32.xlu1 %v720_v51, %s843_s28 }
 0x3ae   :  { %v722_v53 = vpop.eup %721 }
 0x3af   :  { %v427_v54 = vmul.f32 0.5, %v722_v53 }
 0x3b1   :  { %v428_v55 = vadd.f32 0.5, %v427_v54 }
 0x3b3   :  { %v438_v59 = vmul.f32 %v436_v58, %v428_v55 }
 0x41f   :  { %v441_v56 = vpop.permute.xlu1 %440 }
 0x420   :  { %v443_v57 = vmul.f32 %v441_v56, %v428_v55 }
 0x422   :  { %445 = vrot.lane.b32.xlu1 %v443_v57, %s844_s11 }
 0x494   :  { %v446_v60 = vpop.permute.xlu1 %445 }
 0x495   :  { %v448_v61 = vadd.f32 %v446_v60, %v438_v59 }
 0x497   :  { %723 = vtanh.f32 %v448_v61 }
 0x4a4   :  { %v724_v3 = vpop.eup %723 }
 0x4a5   :  { %451 = vrot.lane.b32.xlu0 %v724_v3, %s843_s28 }
 0x517   :  { %v452_v4 = vpop.permute.xlu0 %451 }
 0x518   :  { %v454_v5 = vmul.f32 %v452_v4, %v428_v55 }
 0x51a   :  { %v467_v6 = vmax.f32 %v454_v5, 0.0 }
 0x51c   :  { %474 = vrot.lane.b32.xlu1 %v467_v6, %s844_s11 }
 0x58e   :  { %v475_v7 = vpop.permute.xlu1 %474 }
 0x58f   :  { %697 = vmatmul.mubr.msk.f32.vlgmr.msra.gmra.mxu0 %vm73_vm1, %v475_v7 }
 0x64f   :  { %v544_v9 = vpop.f32.mrf.mxu0 }
 0x650   :  { %v545_v10 = vadd.f32 %v544_v9, %v472_v8 }
 0x651   :  { %v698_v0 = vpop.f32.mrf.mxu0 }
 0x652   :  { %v549_v11 = vsel %vm548_vm3, %v545_v10, -inf }
 0x653   :  { %550 = vmax.xlane.f32.xlu0 %v549_v11 }
 0x669   :  { %456 = vrot.lane.b32.xlu0 %v454_v5, %s844_s11 }
 0x66d   :  { %462 = vrot.lane.b32.xlu0 %v448_v61, %s845_s6 }
 0x6dc   :  { %v551_v12 = vpop.xlane.xlu0 %550 }
 0x6dd   :  { %v552_v13 = vsub.f32 %v545_v10, %v551_v12 }
 0x6df   :  { %v553_v14 = vmul.f32 1.442695, %v552_v13 }
 0x6e0   :  { %v457_v15 = vpop.permute.xlu0 %456 }
 0x6e1   :  { %725 = vpow2.f32 %v553_v14  ;;  %460 = vst.msk [vmem:[#allocation8 + $0x1] sm:$0x1] %vm256_vm2, %v457_v15 }
 0x6e4   :  { %v463_v16 = vpop.permute.xlu0 %462 }
 0x6e5   :  { %466 = vst.msk [vmem:[#allocation10 + $0x1] sm:$0x1] %vm256_vm2, %v463_v16 }
 0x6ee   :  { %v726_v17 = vpop.eup %725 }
 0x6ef   :  { %v555_v18 = vsel %vm548_vm3, %v726_v17, 0.0 }
 0x6f0   :  { %556 = vadd.xlane.f32.xlu1 %v555_v18 }
 0x701   :  { %259 = vrot.lane.b32.xlu1 %v947_v29, %s845_s6 }
 0x702   :  { %780 = shalt.err (!%p777_p0)
}
 0x703   :  { %s847_s25 = smov 16   ;;  %s848_s26 = smov 1  }
 0x704   :  { %583 = dma.vmem_to_hbm [thread:$0]  %s578_s3, 32, %s1023_s9, [#allocation9], %s847_s25, %s847_s25, %s848_s26  }
 0x705   :  { %s849_s28 = smov [#allocation10]  }
 0x706   :  { %s589_s29 = sshll.u32 %s849_s28, 4  ;;  %s590_s29 = int_to_ptr.vmem [resolvable:$true] %s589_s29 }
 0x707   :  { %s789_s30 = scalar_lea.vmem %s590_s29, 32  ;;  %p794_p2 = scmp.lt.s32.totalorder %s590_s29, %s590_s29 }
 0x708   :  { %p790_p1 = scmp.ne.s32.totalorder %s590_s29, %s789_s30  ;;  %p795_p3 = scmp.lt.s32.totalorder %s789_s30, %s789_s30 }
 0x70a   :  { %p796_p4 = por %p795_p3, %p794_p2 }
 0x70c   :  { %p797_p5 = pnand %p796_p4, %p790_p1 }
 0x779   :  { %v557_v19 = vpop.xlane.xlu1 %556 }
 0x77a   :  { %727 = vlog2.f32 %v557_v19 }
 0x77d   :  { %v260_v20 = vpop.permute.xlu1 %259 }
 0x77e   :  { %262 = vst.msk [vmem:[#allocation10] sm:$0x1] %vm256_vm2, %v260_v20 }
 0x77f   :  { %800 = shalt.err (!%p797_p5)
}
 0x780   :  { %595 = dma.vmem_to_hbm [thread:$0]  %s590_s29, 32, %s1024_s10, [#allocation9], %s847_s25, %s847_s25, %s848_s26  }
 0x781   :  { %s850_s9 = smov [#allocation7]  }
 0x782   :  { %s568_s13 = sshll.u32 %s850_s9, 4  ;;  %s569_s13 = int_to_ptr.vmem [resolvable:$true] %s568_s13 }
 0x783   :  { %s809_s1 = scalar_lea.vmem %s569_s13, 16  ;;  %s813_s14 = scalar_lea.vmem %s569_s13, 32 }
 0x784   :  { %p810_p6 = scmp.ne.s32.totalorder %s569_s13, %s809_s1  ;;  %p814_p7 = scmp.lt.s32.totalorder %s569_s13, %s569_s13 }
 0x785   :  { %p815_p8 = scmp.lt.s32.totalorder %s813_s14, %s809_s1 }
 0x787   :  { %v728_v21 = vpop.eup %727  ;;  %p816_p9 = por %p815_p8, %p814_p7 }
 0x788   :  { %v559_v22 = vmul.f32 0.6931472, %v728_v21 }
 0x789   :  { %p817_p10 = pnand %p816_p9, %p810_p6 }
 0x78a   :  { %v560_v23 = vsub.f32 %v552_v13, %v559_v22 }
 0x78c   :  { %561 = vst.msk [vmem:[#allocation7] sm:$0x1] %vm548_vm3, %v560_v23 }
 0x78d   :  { %820 = shalt.err (!%p817_p10)
}
 0x78e   :  { %571 = dma.vmem_to_hbm [thread:$0]  %s569_s13, 16, %s1022_s8, [#allocation4]  }
 0x78f   :  { %833 = dma.done.wait [#allocation4], 16  }
 0x790   :  { %834 = vsyncadd [#allocation4], 4294967280 }
 0x791   :  { %835 = dma.done.wait [#allocation9], 64  }
 0x792   :  { %836 = vsyncadd [#allocation9], 4294967232 }
 0x793   :  { %605 = vsyncpa [#allocation3], 1 }
 0x794   :  { %606 = vsyncpa [#allocation6], 1 }
 0x795   :  { %607 = vsyncpa [#allocation4], 1 }
 0x796   :  { %608 = vsyncpa [#allocation9], 1 }

</bundles_post_ra>
